<compile_context>
chip_gen: v7x
topology: tpu7x:2x2x1
jax: 0.10.0
libtpu: 0.0.40
codegen_flags: <defaults>
</compile_context>

<pallas_src>
import functools
import math

import jax
import jax.numpy as jnp
from jax.experimental import pallas as pl
from jax.experimental.pallas import tpu as pltpu

_TAU = 0.2
_EPS = 1e-12          # F.normalize eps
_EPS2 = _EPS * _EPS


def _ceil_to(x, m):
    return ((x + m - 1) // m) * m


# ---------------------------------------------------------------------------
# Kernel 1: normalize both views once, cast to the MXU operand dtype, and
#           compute the diagonal sim_ii / tau in full f32.
# ---------------------------------------------------------------------------
def _normalize_diag_kernel(h1_ref, h2_ref, z1_ref, z2_ref, diag_ref,
                           *, inv_tau, compute_dtype):
    h1 = h1_ref[...].astype(jnp.float32)
    h2 = h2_ref[...].astype(jnp.float32)
    inv1 = jax.lax.rsqrt(jnp.maximum(jnp.sum(h1 * h1, axis=-1, keepdims=True), _EPS2))
    inv2 = jax.lax.rsqrt(jnp.maximum(jnp.sum(h2 * h2, axis=-1, keepdims=True), _EPS2))
    z1 = h1 * inv1
    z2 = h2 * inv2
    z1_ref[...] = z1.astype(compute_dtype)
    z2_ref[...] = z2.astype(compute_dtype)
    # diag(sim)/tau via an O(tm*D) elementwise dot -- no eye/iota masks, f32.
    diag_ref[...] = jnp.sum(z1 * z2, axis=-1, keepdims=True) * inv_tau


# ---------------------------------------------------------------------------
# Kernel 2: tiled exp(sim) row/column sums over the N x N similarity matrix.
# ---------------------------------------------------------------------------
def _infonce_tile_kernel(z1_ref, z2_ref,                       # inputs
                         row_out_ref, col_out_ref,             # outputs
                         row_sum_ref,                          # scratch
                         *, inv_tau, n_valid, needs_mask):
    i = pl.program_id(0)            # row-tile index    ("parallel")
    j = pl.program_id(1)            # column-tile index ("arbitrary" reduction)
    nc = pl.num_programs(1)
    tm = z1_ref.shape[0]
    tn = z2_ref.shape[0]

    @pl.when(j == 0)
    def _init():
        row_sum_ref[...] = jnp.zeros_like(row_sum_ref)

    # MXU: NT contraction (contract last dims of both operands), f32 accumulation.
    sim = jax.lax.dot_general(
        z1_ref[...], z2_ref[...],
        dimension_numbers=(((1,), (1,)), ((), ())),
        preferred_element_type=jnp.float32) * inv_tau            # (tm, tn) f32

    e = jnp.exp(sim)                 # tau=0.2, |z1.z2| <= 1  ->  |sim| <= 5, safe
    if needs_mask:
        # Padded rows/cols are zero vectors -> sim = 0 -> exp = 1; zero them so
        # they never pollute the row/column exp-sums.
        rid = i * tm + jax.lax.broadcasted_iota(jnp.int32, (tm, 1), 0)
        cid = j * tn + jax.lax.broadcasted_iota(jnp.int32, (1, tn), 1)
        e = jnp.where((rid < n_valid) & (cid < n_valid), e, 0.0)

    # Row log-sum-exp accumulation + lane-dense per-tile column sums.
    row_sum_ref[...] += jnp.sum(e, axis=1, keepdims=True)
    col_out_ref[...] = jnp.sum(e, axis=0, keepdims=True).reshape(1, 1, tn)

    @pl.when(j == nc - 1)
    def _finalize():
        # 0.5 * log(row exp-sum).  Padded rows are sliced away in the epilogue;
        # the clamp only keeps the buffer finite.
        row_out_ref[...] = 0.5 * jnp.log(jnp.maximum(row_sum_ref[...], 1e-30))


def dual_branch_contrast_l2l(h1, h2, tau=_TAU, *, block_rows=512, block_cols=512,
                             precise=False, vmem_limit_bytes=48 * 1024 * 1024):
    """DualBranchContrast(loss=InfoNCE(tau), mode='L2L').forward(h1, h2)."""
    assert h1.shape == h2.shape and h1.ndim == 2
    n, d = h1.shape

    # ---- tile / padding geometry (lane = 128; sublane granularity 16 so that
    #      bf16 row tiles are natively packed) ----
    block_rows = _ceil_to(max(int(block_rows), 16), 16)
    block_cols = _ceil_to(max(int(block_cols), 128), 128)
    tm = min(block_rows, _ceil_to(n, 16))
    tn = min(block_cols, _ceil_to(n, 128))
    n_pad = _ceil_to(n, math.lcm(tm, tn))
    if n_pad <= block_rows:
        tm = n_pad
    if n_pad <= block_cols:
        tn = n_pad
    d_pad = _ceil_to(d, 128)          # zero-padding D is benign (norms, dots)
    nr, nc = n_pad // tm, n_pad // tn
    needs_mask = (n_pad != n)         # padded rows/cols must not feed exp-sums

    h1p = jnp.pad(h1.astype(jnp.float32), ((0, n_pad - n), (0, d_pad - d)))
    h2p = jnp.pad(h2.astype(jnp.float32), ((0, n_pad - n), (0, d_pad - d)))

    compute_dtype = jnp.float32 if precise else jnp.bfloat16

    # ---- prologue: normalize once, diag(sim)/tau, cast z1/z2 to operand dtype ----
    norm_kernel = functools.partial(
        _normalize_diag_kernel, inv_tau=float(1.0 / tau),
        compute_dtype=compute_dtype)
    z1, z2, diag = pl.pallas_call(
        norm_kernel,
        grid=(nr,),
        in_specs=[pl.BlockSpec((tm, d_pad), lambda i: (i, 0)),
                  pl.BlockSpec((tm, d_pad), lambda i: (i, 0))],
        out_specs=[pl.BlockSpec((tm, d_pad), lambda i: (i, 0)),
                   pl.BlockSpec((tm, d_pad), lambda i: (i, 0)),
                   pl.BlockSpec((tm, 1), lambda i: (i, 0))],
        out_shape=[jax.ShapeDtypeStruct((n_pad, d_pad), compute_dtype),
                   jax.ShapeDtypeStruct((n_pad, d_pad), compute_dtype),
                   jax.ShapeDtypeStruct((n_pad, 1), jnp.float32)],
        compiler_params=pltpu.CompilerParams(
            dimension_semantics=("parallel",),
            vmem_limit_bytes=int(vmem_limit_bytes)),
    )(h1p, h2p)

    # ---- main pass: tiled exp(sim) row/column sums over the N x N matrix ----
    main_kernel = functools.partial(
        _infonce_tile_kernel, inv_tau=float(1.0 / tau), n_valid=n,
        needs_mask=needs_mask)
    row_half_log, col_part = pl.pallas_call(
        main_kernel,
        grid=(nr, nc),
        in_specs=[
            pl.BlockSpec((tm, d_pad), lambda i, j: (i, 0)),    # z1 row tile
            pl.BlockSpec((tn, d_pad), lambda i, j: (j, 0)),    # z2 column tile
        ],
        out_specs=[
            pl.BlockSpec((tm, 1), lambda i, j: (i, 0)),        # 0.5*log(rowsum)
            pl.BlockSpec((1, 1, tn), lambda i, j: (i, 0, j)),  # per-row-tile col sums
        ],
        out_shape=[
            jax.ShapeDtypeStruct((n_pad, 1), jnp.float32),
            jax.ShapeDtypeStruct((nr, 1, n_pad), jnp.float32),
        ],
        scratch_shapes=[pltpu.VMEM((tm, 1), jnp.float32)],     # row exp-sum acc
        compiler_params=pltpu.CompilerParams(
            dimension_semantics=("parallel", "arbitrary"),
            vmem_limit_bytes=int(vmem_limit_bytes)),
    )(z1, z2)

    # Tiny O(N * N/tm) epilogue: cross-row-tile column-sum reduction + means.
    col_sums = jnp.sum(col_part[:, 0, :], axis=0)[:n]          # (n,)
    loss = (jnp.sum(row_half_log[:n, 0])
            + 0.5 * jnp.sum(jnp.log(col_sums))
            - jnp.sum(diag[:n, 0])) / n
    return loss


def _reference(h1, h2, tau=_TAU):
    """Pure-JAX reference mirroring PyGCL InfoNCE + SameScaleSampler (L2L)."""
    def normalize(x):
        nrm = jnp.sqrt(jnp.sum(x * x, axis=-1, keepdims=True))
        return x / jnp.maximum(nrm, _EPS)

    def infonce(anchor, sample):
        sim = jnp.dot(normalize(anchor), normalize(sample).T,
                      precision=jax.lax.Precision.HIGHEST) / tau
        log_prob = sim - jnp.log(jnp.sum(jnp.exp(sim), axis=1, keepdims=True))
        return -jnp.mean(jnp.diag(log_prob))

    return (infonce(h1, h2) + infonce(h2, h1)) * 0.5


if __name__ == "__main__":
    key = jax.random.PRNGKey(0)
    k1, k2 = jax.random.split(key)

    # Node-level GCL shapes: N nodes x D hidden.  N=300 is deliberately NOT a
    # multiple of the tile so the padding/masking path and a 3x3 grid are used.
    N, D = 300, 32
    h1 = jax.random.normal(k1, (N, D), dtype=jnp.float32)
    h2 = jax.random.normal(k2, (N, D), dtype=jnp.float32)
    ref = _reference(h1, h2)

    # Default path: bf16 MXU operands, f32 accumulation.
    loss = jax.block_until_ready(
        dual_branch_contrast_l2l(h1, h2, block_rows=128, block_cols=128))
    assert jnp.allclose(loss, ref, rtol=1e-2, atol=1e-2), (loss, ref)

    # f32-operand path.
    loss_f32 = jax.block_until_ready(
        dual_branch_contrast_l2l(h1, h2, block_rows=128, block_cols=128,
                                 precise=True))
    assert jnp.allclose(loss_f32, ref, rtol=1e-2, atol=1e-2), (loss_f32, ref)

    # Exact-tiling case (no padding, 2x2 grid).
    N2, D2 = 256, 64
    g1 = jax.random.normal(jax.random.PRNGKey(1), (N2, D2), dtype=jnp.float32)
    g2 = jax.random.normal(jax.random.PRNGKey(2), (N2, D2), dtype=jnp.float32)
    loss2 = jax.block_until_ready(
        dual_branch_contrast_l2l(g1, g2, block_rows=128, block_cols=128))
    ref2 = _reference(g1, g2)
    assert jnp.allclose(loss2, ref2, rtol=1e-2, atol=1e-2), (loss2, ref2)

    print("KERNEL_OK")
</pallas_src>

<mosaic_0001>
module attributes {stable_mosaic.version = 11 : i64} {
  func.func @_normalize_diag_kernel(%arg0: i32, %arg1: memref<128x128xf32, #tpu.memory_space<vmem>>, %arg2: memref<128x128xf32, #tpu.memory_space<vmem>>, %arg3: memref<128x128xbf16, #tpu.memory_space<vmem>>, %arg4: memref<128x128xbf16, #tpu.memory_space<vmem>>, %arg5: memref<128x1xf32, #tpu.memory_space<vmem>>) attributes {dimension_semantics = [#tpu.dimension_semantics<parallel>], iteration_bounds = array<i64: 3>, scalar_prefetch = 0 : i64, scratch_operands = 0 : i64, tpu.core_type = #tpu.core_type<tc>, window_params = [{transform_indices = @transform_0, window_bounds = array<i64: 128, 128>}, {transform_indices = @transform_1, window_bounds = array<i64: 128, 128>}, {transform_indices = @transform_2, window_bounds = array<i64: 128, 128>}, {transform_indices = @transform_3, window_bounds = array<i64: 128, 128>}, {transform_indices = @transform_4, window_bounds = array<i64: 128, 1>}]} {
    %c0 = arith.constant 0 : index
    %c0_0 = arith.constant 0 : index
    %0 = vector.load %arg1[%c0, %c0_0] : memref<128x128xf32, #tpu.memory_space<vmem>>, vector<128x128xf32>
    %c0_1 = arith.constant 0 : index
    %c0_2 = arith.constant 0 : index
    %1 = vector.load %arg2[%c0_1, %c0_2] : memref<128x128xf32, #tpu.memory_space<vmem>>, vector<128x128xf32>
    %2 = arith.mulf %0, %0 : vector<128x128xf32>
    %cst = arith.constant dense<0.000000e+00> : vector<128xf32>
    %3 = vector.multi_reduction <add>, %2, %cst [1] : vector<128x128xf32> to vector<128xf32>
    %4 = vector.shape_cast %3 : vector<128xf32> to vector<128x1xf32>
    %cst_3 = arith.constant 1.000000e-24 : f32
    %5 = vector.broadcast %cst_3 : f32 to vector<128x1xf32>
    %6 = arith.maximumf %4, %5 : vector<128x1xf32>
    %7 = math.rsqrt %6 : vector<128x1xf32>
    %8 = arith.mulf %1, %1 : vector<128x128xf32>
    %cst_4 = arith.constant dense<0.000000e+00> : vector<128xf32>
    %9 = vector.multi_reduction <add>, %8, %cst_4 [1] : vector<128x128xf32> to vector<128xf32>
    %10 = vector.shape_cast %9 : vector<128xf32> to vector<128x1xf32>
    %cst_5 = arith.constant 1.000000e-24 : f32
    %11 = vector.broadcast %cst_5 : f32 to vector<128x1xf32>
    %12 = arith.maximumf %10, %11 : vector<128x1xf32>
    %13 = math.rsqrt %12 : vector<128x1xf32>
    %14 = vector.broadcast %7 : vector<128x1xf32> to vector<128x128xf32>
    %15 = arith.mulf %0, %14 : vector<128x128xf32>
    %16 = vector.broadcast %13 : vector<128x1xf32> to vector<128x128xf32>
    %17 = arith.mulf %1, %16 : vector<128x128xf32>
    %18 = arith.truncf %15 : vector<128x128xf32> to vector<128x128xbf16>
    %c0_6 = arith.constant 0 : index
    %c0_7 = arith.constant 0 : index
    %19 = vector.load %arg3[%c0_6, %c0_7] : memref<128x128xbf16, #tpu.memory_space<vmem>>, vector<128x128xbf16>
    tpu.vector_store %arg3[%c0_6, %c0_7], %18 {strides = array<i32>} : memref<128x128xbf16, #tpu.memory_space<vmem>>, vector<128x128xbf16>,
    %20 = arith.truncf %17 : vector<128x128xf32> to vector<128x128xbf16>
    %c0_8 = arith.constant 0 : index
    %c0_9 = arith.constant 0 : index
    %21 = vector.load %arg4[%c0_8, %c0_9] : memref<128x128xbf16, #tpu.memory_space<vmem>>, vector<128x128xbf16>
    tpu.vector_store %arg4[%c0_8, %c0_9], %20 {strides = array<i32>} : memref<128x128xbf16, #tpu.memory_space<vmem>>, vector<128x128xbf16>,
    %22 = arith.mulf %15, %17 : vector<128x128xf32>
    %cst_10 = arith.constant dense<0.000000e+00> : vector<128xf32>
    %23 = vector.multi_reduction <add>, %22, %cst_10 [1] : vector<128x128xf32> to vector<128xf32>
    %24 = vector.shape_cast %23 : vector<128xf32> to vector<128x1xf32>
    %cst_11 = arith.constant 5.000000e+00 : f32
    %25 = vector.broadcast %cst_11 : f32 to vector<128x1xf32>
    %26 = arith.mulf %24, %25 : vector<128x1xf32>
    %c0_12 = arith.constant 0 : index
    %c0_13 = arith.constant 0 : index
    %27 = vector.load %arg5[%c0_12, %c0_13] : memref<128x1xf32, #tpu.memory_space<vmem>>, vector<128x1xf32>
    tpu.vector_store %arg5[%c0_12, %c0_13], %26 {strides = array<i32>} : memref<128x1xf32, #tpu.memory_space<vmem>>, vector<128x1xf32>,
    return
  }
  func.func @transform_0(%arg0: i32) -> (i32, i32) {
    %c0_i32 = arith.constant 0 : i32
    %c0_i32_0 = arith.constant 0 : i32
    return %arg0, %c0_i32 : i32, i32
  }
  func.func @transform_1(%arg0: i32) -> (i32, i32) {
    %c0_i32 = arith.constant 0 : i32
    %c0_i32_0 = arith.constant 0 : i32
    return %arg0, %c0_i32 : i32, i32
  }
  func.func @transform_2(%arg0: i32) -> (i32, i32) {
    %c0_i32 = arith.constant 0 : i32
    %c0_i32_0 = arith.constant 0 : i32
    return %arg0, %c0_i32 : i32, i32
  }
  func.func @transform_3(%arg0: i32) -> (i32, i32) {
    %c0_i32 = arith.constant 0 : i32
    %c0_i32_0 = arith.constant 0 : i32
    return %arg0, %c0_i32 : i32, i32
  }
  func.func @transform_4(%arg0: i32) -> (i32, i32) {
    %c0_i32 = arith.constant 0 : i32
    %c0_i32_0 = arith.constant 0 : i32
    return %arg0, %c0_i32 : i32, i32
  }
}

</mosaic_0001>

<bundles_post_ra>
// kernel: tpu_custom_call.1
= control target key start
LH: loop header
LB: loop body
LE: loop exit
PB: predicated region body
PF: predicated region fallthrough
CT: control target
= control target key end

     0   :  { %10 = vsyncpa [#allocation3], 0  ;;  %s2040_s0 = inlined_call_operand.hbm [shape: f32[384,128], index: 0, kind: input, shape index: {}]   ;;  %s2041_s1 = inlined_call_operand.hbm [shape: f32[384,128], index: 1, kind: input, shape index: {}]   ;;  %s2042_s2 = inlined_call_operand.hbm [shape: bf16[384,128], index: 2, kind: output, shape index: {0}]   ;;  %s2043_s3 = inlined_call_operand.hbm [shape: bf16[384,128], index: 3, kind: output, shape index: {1}]   ;;  %s2044_s4 = inlined_call_operand.vmem [shape: f32[384,1], index: 4, kind: output, shape index: {2}]  }
   0x1   :  { %12 = vsyncpa [#allocation3 + $0x1], 0 }
   0x2   :  { %13 = vsyncpa [#allocation6], 0 }
   0x3   :  { %15 = vsyncpa [#allocation6 + $0x1], 0 }
   0x4   :  { %16 = vsyncpa [#allocation4], 0 }
   0x5   :  { %18 = vsyncpa [#allocation4 + $0x1], 0 }
   0x6   :  { %19 = vsyncpa [#allocation9], 0 }
   0x7   :  { %21 = vsyncpa [#allocation9 + $0x1], 0  ;;  %s1453_s15 = smov 0   ;;  %s1455_s16 = smov 0  }
   0x8   :  { %s1457_s17 = smov 0   ;;  %s1459_s18 = smov 0  }
   0x9 LB: > { %s1474_s19 = sadd.s32 4294967295, %s1418_s18   ;;  %s946_s20 = sadd.s32 4294967294, %s1418_s18   ;;  %s1418_s18 = sphi %s1459_s18, %s2059_s18   ;;  %s1414_s17 = sphi %s1457_s17, %s2058_s17   ;;  %s1410_s16 = sphi %s1455_s16, %s2057_s16   ;;  %s1406_s15 = sphi %s1453_s15, %s2056_s15  }
   0xa   : > { %s1478_s21 = sadd.s32 1, %s1418_s18   ;;  %s34_s22 = sadd.s32 1, %s1414_s17 }
   0xb   : > { %s31_s23 = ssub.s32 %s1418_s18, %s1478_s21  ;;  %p41_p0 = scmp.ne.s32.totalorder %s1414_s17, %s1410_s16 }
   0xc   : > { %p32_p1 = scmp.eq.s32.totalorder %s31_s23, 0  ;;  %p42_p2 = scmp.eq.s32.totalorder %s1418_s18, 0 }
   0xd   : > { %p47_p3 = scmp.ne.s32.totalorder %s1410_s16, %s1406_s15  ;;  %p48_p4 = scmp.eq.s32.totalorder %s1474_s19, 0 }
   0xe   : > { %s1490_s24 = scalar_select %p32_p1, %s1414_s17, %s34_s22  }
   0xf   : > { %p1492_p5 = por %p42_p2, %p41_p0  ;;  %p1496_p6 = por %p48_p4, %p47_p3 }
  0x10   : > { %p97_p7 = scmp.eq.s32.totalorder %s1474_s19, 2  ;;  %p103_p8 = scmp.eq.s32.totalorder %s946_s20, 2 }
  0x11   : > { %s2048_s26 = scalar_select %p1496_p6, 1, 0 }
  0x12   : > { %p1154_p9 = scmp.lt.s32.totalorder %s1418_s18, 3  ;;  %p1502_p10 = por %p97_p7, %p41_p0 }
  0x13   : > { %p1506_p11 = por %p103_p8, %p47_p3  ;;  %s1511_s29 = sand.u32 1, %s1414_s17  }
  0x14   : > { %s2049_s27 = scalar_select %p1502_p10, 1, 0 }
  0x15   : > { %s2050_s28 = scalar_select %p1506_p11, 1, 0 }
  0x16   : > { %s1002_s30 = sshll.u32 %s1418_s18, 11  ;;  %s949_s5 = sshll.u32 %s1511_s29, 7 }
  0x17   : > { %s1520_s8 = scalar_lea.hbm %s2040_s0, %s1002_s30  ;;  %s179_s9 = scalar_lea.vmem [#allocation2], %s949_s5 }
  0x18   : > { %s186_s10 = sshll.u32 %s179_s9, 4  ;;  %p1526_p12 = pnand %p1154_p9, %p1492_p5  ;;  %s1530_s10 = int_to_ptr.vmem [resolvable:$true] %s186_s10 }
  0x19   : > { %s176_s12 = scalar_lea.sflag [#allocation3], %s1511_s29  ;;  %s1256_s13 = scalar_lea.hbm %s1520_s8, 2048 }
  0x1a   : > { %p1257_p13 = scmp.ne.s32.totalorder %s1520_s8, %s1256_s13  ;;  %p1258_p0 = pneg %p1526_p12 }
  0x1b   : > { %s1261_s22 = scalar_lea.hbm %s2040_s0, 6144  ;;  %p1262_p3 = scmp.lt.u32.totalorder %s1520_s8, %s2040_s0 }
  0x1c   : > { %p1259_p1 = pnand %p1258_p0, %p1257_p13  ;;  %p1263_p4 = scmp.lt.u32.totalorder %s1261_s22, %s1256_s13 }
  0x1d   : > { %p1265_p7 = scmp.lt.u32.totalorder %s1256_s13, %s1520_s8 }
  0x1e   : > { %p1260_p2 = pneg %p1259_p1  ;;  %p1264_p5 = por %p1263_p4, %p1262_p3 }
  0x20   : > { %p1266_p8 = por %p1265_p7, %p1264_p5 }
  0x22   : > { %p1267_p9 = pnand %p1266_p8, %p1260_p2 }
  0x24   : > { %1270 = shalt.err (!%p1267_p9)
}
  0x25   : > { %s1271_s6 = scalar_lea.vmem %s1530_s10, 2048  ;;  %s1420_s7 = smov [#allocation2]  }
  0x26   : > { %p1272_p13 = scmp.ne.s32.totalorder %s1530_s10, %s1271_s6  ;;  %s1276_s9 = sshll.u32 %s1420_s7, 4  ;;  %s1277_s9 = int_to_ptr.vmem [resolvable:$false] %s1276_s9 }
  0x27   : > { %s1278_s14 = scalar_lea.vmem %s1277_s9, 4096  ;;  %p1279_p10 = scmp.lt.s32.totalorder %s1530_s10, %s1277_s9 }
  0x28   : > { %p1274_p1 = pnand %p1272_p13, %p1258_p0  ;;  %p1280_p3 = scmp.lt.s32.totalorder %s1278_s14, %s1271_s6 }
  0x2a   : > { %p1275_p11 = pneg %p1274_p1  ;;  %p1281_p4 = por %p1280_p3, %p1279_p10 }
  0x2c   : > { %p1282_p5 = pnand %p1281_p4, %p1275_p11 }
  0x2e   : > { %1285 = shalt.err (!%p1282_p5)
}
  0x2f   : > { %s1421_s13 = smov 128   ;;  %s1422_s20 = smov 8  }
  0x30   : > { %1143 = dma.hbm_to_vmem [thread:$0]  (!%p1526_p12), %s1520_s8, 2048, %s1530_s10, %s176_s12, %s1421_s13, %s1421_s13, %s1422_s20  }
  0x31   : > { %p955_p10 = scmp.ge.s32.totalorder %s1418_s18, 1  ;;  %p215_p11 = scmp.lt.s32.totalorder %s1418_s18, 4 }
  0x32   : > { %s1574_s6 = scalar_lea.hbm %s2041_s1, %s1002_s30  ;;  %s200_s7 = scalar_lea.vmem [#allocation5], %s949_s5 }
  0x33   : > { %p1565_p2 = pnand %p955_p10, %p215_p11  ;;  %s207_s9 = sshll.u32 %s200_s7, 4  ;;  %s1578_s9 = int_to_ptr.vmem [resolvable:$true] %s207_s9 }
  0x34   : > { %s197_s8 = scalar_lea.sflag [#allocation6], %s1511_s29  ;;  %s1286_s10 = scalar_lea.hbm %s1574_s6, 2048 }
  0x35   : > { %p1287_p7 = scmp.ne.s32.totalorder %s1574_s6, %s1286_s10  ;;  %s1291_s30 = scalar_lea.hbm %s2041_s1, 6144 }
  0x36   : > { %p1292_p13 = scmp.lt.u32.totalorder %s1574_s6, %s2041_s1  ;;  %p1293_p1 = scmp.lt.u32.totalorder %s1291_s30, %s1286_s10 }
  0x37   : > { %p1289_p8 = pnand %p1287_p7, %p1258_p0  ;;  %p1295_p4 = scmp.lt.u32.totalorder %s1286_s10, %s1574_s6 }
  0x38   : > { %p1294_p3 = por %p1293_p1, %p1292_p13 }
  0x39   : > { %p1290_p9 = pneg %p1289_p8 }
  0x3a   : > { %p1296_p5 = por %p1295_p4, %p1294_p3 }
  0x3c   : > { %p1297_p10 = pnand %p1296_p5, %p1290_p9 }
  0x3e   : > { %1300 = shalt.err (!%p1297_p10)
}
  0x3f   : > { %s1301_s5 = scalar_lea.vmem %s1578_s9, 2048  ;;  %s1423_s7 = smov [#allocation5]  }
  0x40   : > { %p1302_p11 = scmp.ne.s32.totalorder %s1578_s9, %s1301_s5  ;;  %s1306_s12 = sshll.u32 %s1423_s7, 4  ;;  %s1307_s12 = int_to_ptr.vmem [resolvable:$false] %s1306_s12 }
  0x41   : > { %s1308_s14 = scalar_lea.vmem %s1307_s12, 4096  ;;  %p1309_p6 = scmp.lt.s32.totalorder %s1578_s9, %s1307_s12 }
  0x42   : > { %p1304_p7 = pnand %p1302_p11, %p1258_p0  ;;  %p1310_p13 = scmp.lt.s32.totalorder %s1308_s14, %s1301_s5 }
  0x44   : > { %p1305_p8 = pneg %p1304_p7  ;;  %p1311_p1 = por %p1310_p13, %p1309_p6 }
  0x46   : > { %p1312_p3 = pnand %p1311_p1, %p1305_p8 }
  0x48   : > { %1315 = shalt.err (!%p1312_p3)
}
  0x49   : > { %1146 = dma.hbm_to_vmem [thread:$0]  (!%p1526_p12), %s1574_s6, 2048, %s1578_s9, %s197_s8, %s1421_s13, %s1421_s13, %s1422_s20  }
  0x4a   : > { %219 = sbr.rel (%p1565_p2) target bundleno = 452 (0x1c4), region = 28  ;;  %s1612_s10 = sand.u32 (!%p1565_p2), 1, %s1410_s16  }
  0x4b   : > { %s956_s30 = sshll.u32 (!%p1565_p2), %s1612_s10, 7  ;;  %s222_s23 = scalar_lea.sflag (!%p1565_p2), [#allocation3], %s1612_s10 }
  0x4c   : > { %s1616_s11 = scalar_lea.vmem (!%p1565_p2), [#allocation2], %s956_s30  ;;  %p2053_p6 = scmp.ne.s32.totalorder (!%p1565_p2), %s2048_s26, 0 }
  0x51   : > { %1389 = dma.done.wait (%p2053_p6), %s222_s23, 2048  }
  0x52   : > { %1391 = vsyncadd (%p2053_p6), %s222_s23, 4294965248  ;;  %s231_s29 = scalar_lea.sflag [#allocation6], %s1612_s10  ;;  %s1623_s13 = scalar_lea.vmem [#allocation5], %s956_s30 }
  0x53   : > { %1393 = dma.done.wait (%p2053_p6), %s231_s29, 2048  }
  0x54   : > { %1395 = vsyncadd (%p2053_p6), %s231_s29, 4294965248  ;;  %v1630_v0 = vld [vmem:[%s1616_s11 + $0x10] sm:$0xff]  ;;  %v1633_v1 = vld [vmem:[%s1616_s11] sm:$0xff]  ;;  %s958_s26 = sshll.u32 %s1612_s10, 6  ;;  %s1036_s6 = sshll.u32 %s1474_s19, 10 }
  0x55   : > { %v1636_v2 = vld [vmem:[%s1616_s11 + $0x18] sm:$0xff]  ;;  %v318_v3 = vmul.f32 %v1630_v0, %v1630_v0  ;;  %v316_v4 = vmul.f32 %v1633_v1, %v1633_v1  ;;  %v1643_v5 = vld [vmem:[%s1616_s11 + $0x8] sm:$0xff]  ;;  %v1653_v9 = vld [vmem:[%s1616_s11 + $0x20] sm:$0xff]  ;;  %s1808_s20 = scalar_lea.vmem [#allocation7], %s958_s26  ;;  %s1873_s22 = scalar_lea.vmem [#allocation8], %s958_s26 }
  0x56   : > { %v319_v6 = vmul.f32 %v1636_v2, %v1636_v2  ;;  %v317_v7 = vmul.f32 %v1643_v5, %v1643_v5  ;;  %v1650_v8 = vld [vmem:[%s1616_s11 + $0x28] sm:$0xff]  ;;  %v320_v11 = vmul.f32 %v1653_v9, %v1653_v9  ;;  %v1660_v12 = vld [vmem:[%s1616_s11 + $0x38] sm:$0xff]  ;;  %v1663_v13 = vld [vmem:[%s1616_s11 + $0x30] sm:$0xff]  ;;  %s773_s9 = sshll.u32 %s1808_s20, 4  ;;  %s1917_s5 = scalar_lea.hbm %s2042_s2, %s1036_s6  ;;  %s1919_s9 = int_to_ptr.vmem [resolvable:$true] %s773_s9 }
  0x57   : > { %336 = vadd.xlane.f32.xlu1 %v318_v3  ;;  %332 = vadd.xlane.f32.xlu0 %v316_v4  ;;  %v321_v10 = vmul.f32 %v1650_v8, %v1650_v8  ;;  %v323_v14 = vmul.f32 %v1660_v12, %v1660_v12  ;;  %v322_v15 = vmul.f32 %v1663_v13, %v1663_v13  ;;  %v1670_v16 = vld [vmem:[%s1616_s11 + $0x48] sm:$0xff]  ;;  %v1673_v17 = vld [vmem:[%s1616_s11 + $0x40] sm:$0xff]  ;;  %v1680_v20 = vld [vmem:[%s1616_s11 + $0x58] sm:$0xff]  ;;  %s750_s7 = scalar_lea.sflag [#allocation4], %s1612_s10  ;;  %s1316_s12 = scalar_lea.vmem %s1919_s9, 1024 }
  0x58   : > { %v325_v18 = vmul.f32 %v1670_v16, %v1670_v16  ;;  %v324_v19 = vmul.f32 %v1673_v17, %v1673_v17  ;;  %v1683_v21 = vld [vmem:[%s1616_s11 + $0x50] sm:$0xff]  ;;  %v327_v22 = vmul.f32 %v1680_v20, %v1680_v20  ;;  %v1690_v24 = vld [vmem:[%s1616_s11 + $0x68] sm:$0xff]  ;;  %v1693_v25 = vld [vmem:[%s1616_s11 + $0x60] sm:$0xff]  ;;  %p1317_p12 = scmp.ne.s32.totalorder %s1919_s9, %s1316_s12  ;;  %p2054_p0 = scmp.ne.s32.totalorder %s2049_s27, 0 }
  0x59   : > { %v326_v23 = vmul.f32 %v1683_v21, %v1683_v21  ;;  %v329_v26 = vmul.f32 %v1690_v24, %v1690_v24  ;;  %v328_v27 = vmul.f32 %v1693_v25, %v1693_v25  ;;  %v1700_v28 = vld [vmem:[%s1616_s11 + $0x78] sm:$0xff]  ;;  %v1703_v29 = vld [vmem:[%s1616_s11 + $0x70] sm:$0xff]  ;;  %v1710_v32 = vld [vmem:[%s1623_s13 + $0x8] sm:$0xff]  ;;  %s1424_s14 = smov [#allocation7]  }
  0x5a   : > { %v331_v30 = vmul.f32 %v1700_v28, %v1700_v28  ;;  %v330_v31 = vmul.f32 %v1703_v29, %v1703_v29  ;;  %v1713_v33 = vld [vmem:[%s1623_s13] sm:$0xff]  ;;  %v397_v34 = vmul.f32 %v1710_v32, %v1710_v32  ;;  %v1720_v36 = vld [vmem:[%s1623_s13 + $0x18] sm:$0xff]  ;;  %v1723_v37 = vld [vmem:[%s1623_s13 + $0x10] sm:$0xff]  ;;  %p1318_p2 = pnand %p1317_p12, %p2054_p0  ;;  %s1320_s30 = sshll.u32 %s1424_s14, 4  ;;  %s1321_s30 = int_to_ptr.vmem [resolvable:$false] %s1320_s30 }
  0x5b   : > { %338 = vadd.xlane.f32.xlu1 %v319_v6  ;;  %334 = vadd.xlane.f32.xlu0 %v317_v7  ;;  %v396_v35 = vmul.f32 %v1713_v33, %v1713_v33  ;;  %v399_v38 = vmul.f32 %v1720_v36, %v1720_v36  ;;  %v398_v39 = vmul.f32 %v1723_v37, %v1723_v37  ;;  %v1730_v40 = vld [vmem:[%s1623_s13 + $0x28] sm:$0xff]  ;;  %v1733_v41 = vld [vmem:[%s1623_s13 + $0x20] sm:$0xff]  ;;  %v1740_v44 = vld [vmem:[%s1623_s13 + $0x38] sm:$0xff]  ;;  %s1322_s23 = scalar_lea.vmem %s1321_s30, 2048  ;;  %p1323_p4 = scmp.lt.s32.totalorder %s1919_s9, %s1321_s30 }
  0x5c   : > { %v401_v42 = vmul.f32 %v1730_v40, %v1730_v40  ;;  %v400_v43 = vmul.f32 %v1733_v41, %v1733_v41  ;;  %v1743_v45 = vld [vmem:[%s1623_s13 + $0x30] sm:$0xff]  ;;  %v403_v46 = vmul.f32 %v1740_v44, %v1740_v44  ;;  %v1750_v48 = vld [vmem:[%s1623_s13 + $0x48] sm:$0xff]  ;;  %v1753_v49 = vld [vmem:[%s1623_s13 + $0x40] sm:$0xff]  ;;  %p1319_p9 = pneg %p1318_p2  ;;  %p1324_p5 = scmp.lt.s32.totalorder %s1322_s23, %s1316_s12 }
  0x5d   : > { %v402_v47 = vmul.f32 %v1743_v45, %v1743_v45  ;;  %v405_v50 = vmul.f32 %v1750_v48, %v1750_v48  ;;  %v404_v51 = vmul.f32 %v1753_v49, %v1753_v49  ;;  %v1760_v52 = vld [vmem:[%s1623_s13 + $0x58] sm:$0xff]  ;;  %v1763_v53 = vld [vmem:[%s1623_s13 + $0x50] sm:$0xff]  ;;  %v1770_v56 = vld [vmem:[%s1623_s13 + $0x68] sm:$0xff] }
  0x5e   : > { %v407_v54 = vmul.f32 %v1760_v52, %v1760_v52  ;;  %v406_v55 = vmul.f32 %v1763_v53, %v1763_v53  ;;  %v1773_v57 = vld [vmem:[%s1623_s13 + $0x60] sm:$0xff]  ;;  %v409_v58 = vmul.f32 %v1770_v56, %v1770_v56  ;;  %v1780_v60 = vld [vmem:[%s1623_s13 + $0x78] sm:$0xff]  ;;  %v1783_v61 = vld [vmem:[%s1623_s13 + $0x70] sm:$0xff]  ;;  %p1325_p10 = por %p1324_p5, %p1323_p4 }
  0x5f   : > { %342 = vadd.xlane.f32.xlu1 %v321_v10  ;;  %340 = vadd.xlane.f32.xlu0 %v320_v11  ;;  %v408_v59 = vmul.f32 %v1773_v57, %v1773_v57  ;;  %v411_v62 = vmul.f32 %v1780_v60, %v1780_v60  ;;  %v410_v63 = vmul.f32 %v1783_v61, %v1783_v61 }
  0x60   : > { %p1326_p11 = pnand %p1325_p10, %p1319_p9 }
  0x63   : > { %346 = vadd.xlane.f32.xlu1 %v323_v14  ;;  %344 = vadd.xlane.f32.xlu0 %v322_v15 }
  0x67   : > { %350 = vadd.xlane.f32.xlu1 %v325_v18  ;;  %348 = vadd.xlane.f32.xlu0 %v324_v19 }
  0x6b   : > { %354 = vadd.xlane.f32.xlu1 %v327_v22  ;;  %352 = vadd.xlane.f32.xlu0 %v326_v23 }
  0x6f   : > { %358 = vadd.xlane.f32.xlu1 %v329_v26  ;;  %356 = vadd.xlane.f32.xlu0 %v328_v27 }
  0x73   : > { %362 = vadd.xlane.f32.xlu1 %v331_v30  ;;  %360 = vadd.xlane.f32.xlu0 %v330_v31 }
  0x77   : > { %414 = vadd.xlane.f32.xlu1 %v397_v34  ;;  %412 = vadd.xlane.f32.xlu0 %v396_v35 }
  0x7b   : > { %418 = vadd.xlane.f32.xlu1 %v399_v38  ;;  %416 = vadd.xlane.f32.xlu0 %v398_v39 }
  0x7f   : > { %422 = vadd.xlane.f32.xlu1 %v401_v42  ;;  %420 = vadd.xlane.f32.xlu0 %v400_v43 }
  0x83   : > { %426 = vadd.xlane.f32.xlu1 %v403_v46  ;;  %424 = vadd.xlane.f32.xlu0 %v402_v47 }
  0x87   : > { %430 = vadd.xlane.f32.xlu1 %v405_v50  ;;  %428 = vadd.xlane.f32.xlu0 %v404_v51 }
  0x8b   : > { %434 = vadd.xlane.f32.xlu1 %v407_v54  ;;  %432 = vadd.xlane.f32.xlu0 %v406_v55 }
  0x8f   : > { %438 = vadd.xlane.f32.xlu1 %v409_v58  ;;  %436 = vadd.xlane.f32.xlu0 %v408_v59 }
  0x93   : > { %442 = vadd.xlane.f32.xlu1 %v411_v62  ;;  %440 = vadd.xlane.f32.xlu0 %v410_v63 }
  0xe4   : > { %v337_v3 = vpop.xlane.xlu1 %336  ;;  %v333_v4 = vpop.xlane.xlu0 %332 }
  0xe5   : > { %v366_v6 = vmax.f32 %v337_v3, 1e-24  ;;  %v364_v7 = vmax.f32 %v333_v4, 1e-24 }
  0xe7   : > { %1192 = vrsqrt.f32 %v366_v6 }
  0xe8   : > { %v339_v10 = vpop.xlane.xlu1 %338  ;;  %v335_v11 = vpop.xlane.xlu0 %334  ;;  %1194 = vrsqrt.f32 %v364_v7 }
  0xe9   : > { %v367_v14 = vmax.f32 %v339_v10, 1e-24  ;;  %v365_v15 = vmax.f32 %v335_v11, 1e-24 }
  0xeb   : > { %1196 = vrsqrt.f32 %v367_v14 }
  0xec   : > { %1198 = vrsqrt.f32 %v365_v15  ;;  %v343_v18 = vpop.xlane.xlu1 %342  ;;  %v341_v19 = vpop.xlane.xlu0 %340 }
  0xed   : > { %v369_v22 = vmax.f32 %v343_v18, 1e-24  ;;  %v368_v23 = vmax.f32 %v341_v19, 1e-24 }
  0xef   : > { %1200 = vrsqrt.f32 %v369_v22 }
  0xf0   : > { %1202 = vrsqrt.f32 %v368_v23  ;;  %v347_v26 = vpop.xlane.xlu1 %346  ;;  %v345_v27 = vpop.xlane.xlu0 %344 }
  0xf1   : > { %v371_v30 = vmax.f32 %v347_v26, 1e-24  ;;  %v370_v31 = vmax.f32 %v345_v27, 1e-24  ;;  %v1193_v34 = vpop.eup %1192 }
  0xf2   : > { %v1195_v35 = vpop.eup %1194  ;;  %v1794_v51 = vmul.f32 %v1193_v34, %v1630_v0 }
  0xf3   : > { %1204 = vrsqrt.f32 %v371_v30  ;;  %v1800_v55 = vmul.f32 %v1195_v35, %v1633_v1 }
  0xf4   : > { %1206 = vrsqrt.f32 %v370_v31  ;;  %v351_v38 = vpop.xlane.xlu1 %350  ;;  %v349_v39 = vpop.xlane.xlu0 %348 }
  0xf5   : > { %v1197_v42 = vpop.eup %1196  ;;  %v373_v43 = vmax.f32 %v351_v38, 1e-24  ;;  %v372_v46 = vmax.f32 %v349_v39, 1e-24 }
  0xf6   : > { %v1199_v47 = vpop.eup %1198  ;;  %v1791_v50 = vmul.f32 %v1197_v42, %v1636_v2 }
  0xf7   : > { %1208 = vrsqrt.f32 %v373_v43  ;;  %v1797_v54 = vmul.f32 %v1199_v47, %v1643_v5 }
  0xf8   : > { %1210 = vrsqrt.f32 %v372_v46  ;;  %v355_v58 = vpop.xlane.xlu1 %354  ;;  %v353_v59 = vpop.xlane.xlu0 %352  ;;  %v1046_v62 = vpack.c.bf16 %v1791_v50, %v1794_v51 }
  0xf9   : > { %v1201_v63 = vpop.eup %1200  ;;  %v375_v3 = vmax.f32 %v355_v58, 1e-24  ;;  %v374_v2 = vmax.f32 %v353_v59, 1e-24  ;;  %v1041_v0 = vpack.c.bf16 %v1797_v54, %v1800_v55 }
  0xfa   : > { %v1203_v4 = vpop.eup %1202  ;;  %1118 = vst [vmem:[%s1808_s20 + $0x8] sm:$0xff] %v1046_v62   ;;  %v1812_v1 = vmul.f32 %v1201_v63, %v1650_v8 }
  0xfb   : > { %1212 = vrsqrt.f32 %v375_v3  ;;  %1042 = vst [vmem:[%s1808_s20] sm:$0xff] %v1041_v0   ;;  %v1816_v5 = vmul.f32 %v1203_v4, %v1653_v9 }
  0xfc   : > { %1214 = vrsqrt.f32 %v374_v2  ;;  %v359_v6 = vpop.xlane.xlu1 %358  ;;  %v357_v7 = vpop.xlane.xlu0 %356 }
  0xfd   : > { %v1205_v10 = vpop.eup %1204  ;;  %v377_v11 = vmax.f32 %v359_v6, 1e-24  ;;  %v376_v14 = vmax.f32 %v357_v7, 1e-24  ;;  %v1051_v15 = vpack.c.bf16 %v1812_v1, %v1816_v5 }
  0xfe   : > { %v1207_v18 = vpop.eup %1206  ;;  %v1821_v19 = vmul.f32 %v1205_v10, %v1660_v12 }
  0xff   : > { %1216 = vrsqrt.f32 %v377_v11  ;;  %1119 = vst [vmem:[%s1808_s20 + $0x10] sm:$0xff] %v1051_v15   ;;  %v1825_v8 = vmul.f32 %v1207_v18, %v1663_v13 }
 0x100   : > { %1218 = vrsqrt.f32 %v376_v14  ;;  %v363_v9 = vpop.xlane.xlu1 %362  ;;  %v361_v22 = vpop.xlane.xlu0 %360 }
 0x101   : > { %v1209_v23 = vpop.eup %1208  ;;  %v379_v26 = vmax.f32 %v363_v9, 1e-24  ;;  %v378_v27 = vmax.f32 %v361_v22, 1e-24  ;;  %v1056_v30 = vpack.c.bf16 %v1821_v19, %v1825_v8 }
 0x102   : > { %v1211_v31 = vpop.eup %1210  ;;  %v1830_v34 = vmul.f32 %v1209_v23, %v1670_v16 }
 0x103   : > { %1220 = vrsqrt.f32 %v379_v26  ;;  %1120 = vst [vmem:[%s1808_s20 + $0x18] sm:$0xff] %v1056_v30   ;;  %v1834_v12 = vmul.f32 %v1211_v31, %v1673_v17 }
 0x104   : > { %1222 = vrsqrt.f32 %v378_v27  ;;  %v415_v13 = vpop.xlane.xlu1 %414  ;;  %v413_v35 = vpop.xlane.xlu0 %412 }
 0x105   : > { %v1213_v38 = vpop.eup %1212  ;;  %v445_v39 = vmax.f32 %v415_v13, 1e-24  ;;  %v444_v42 = vmax.f32 %v413_v35, 1e-24  ;;  %v1061_v43 = vpack.c.bf16 %v1830_v34, %v1834_v12 }
 0x106   : > { %v1215_v46 = vpop.eup %1214  ;;  %v1839_v47 = vmul.f32 %v1213_v38, %v1680_v20 }
 0x107   : > { %1224 = vrsqrt.f32 %v445_v39  ;;  %1121 = vst [vmem:[%s1808_s20 + $0x20] sm:$0xff] %v1061_v43   ;;  %v1843_v16 = vmul.f32 %v1215_v46, %v1683_v21 }
 0x108   : > { %1226 = vrsqrt.f32 %v444_v42  ;;  %v419_v17 = vpop.xlane.xlu1 %418  ;;  %v417_v58 = vpop.xlane.xlu0 %416 }
 0x109   : > { %v1217_v59 = vpop.eup %1216  ;;  %v447_v62 = vmax.f32 %v419_v17, 1e-24  ;;  %v446_v63 = vmax.f32 %v417_v58, 1e-24  ;;  %v1066_v3 = vpack.c.bf16 %v1839_v47, %v1843_v16 }
 0x10a   : > { %v1219_v2 = vpop.eup %1218  ;;  %v1848_v0 = vmul.f32 %v1217_v59, %v1690_v24 }
 0x10b   : > { %1228 = vrsqrt.f32 %v447_v62  ;;  %1122 = vst [vmem:[%s1808_s20 + $0x28] sm:$0xff] %v1066_v3   ;;  %v1852_v20 = vmul.f32 %v1219_v2, %v1693_v25 }
 0x10c   : > { %1230 = vrsqrt.f32 %v446_v63  ;;  %v423_v21 = vpop.xlane.xlu1 %422  ;;  %v421_v4 = vpop.xlane.xlu0 %420 }
 0x10d   : > { %v1221_v6 = vpop.eup %1220  ;;  %v449_v7 = vmax.f32 %v423_v21, 1e-24  ;;  %v448_v10 = vmax.f32 %v421_v4, 1e-24  ;;  %v1071_v11 = vpack.c.bf16 %v1848_v0, %v1852_v20 }
 0x10e   : > { %v1223_v14 = vpop.eup %1222  ;;  %v1857_v15 = vmul.f32 %v1221_v6, %v1700_v28 }
 0x10f   : > { %1232 = vrsqrt.f32 %v449_v7  ;;  %1123 = vst [vmem:[%s1808_s20 + $0x30] sm:$0xff] %v1071_v11   ;;  %v1861_v24 = vmul.f32 %v1223_v14, %v1703_v29 }
 0x110   : > { %1234 = vrsqrt.f32 %v448_v10  ;;  %v427_v25 = vpop.xlane.xlu1 %426  ;;  %v425_v18 = vpop.xlane.xlu0 %424 }
 0x111   : > { %v1225_v9 = vpop.eup %1224  ;;  %v451_v22 = vmax.f32 %v427_v25, 1e-24  ;;  %v450_v23 = vmax.f32 %v425_v18, 1e-24  ;;  %v1076_v26 = vpack.c.bf16 %v1857_v15, %v1861_v24 }
 0x112   : > { %v1227_v27 = vpop.eup %1226  ;;  %v493_v30 = vmul.f32 %v1225_v9, %v1710_v32 }
 0x113   : > { %1236 = vrsqrt.f32 %v451_v22  ;;  %v492_v28 = vmul.f32 %v1227_v27, %v1713_v33  ;;  %1124 = vst [vmem:[%s1808_s20 + $0x38] sm:$0xff] %v1076_v26  }
 0x114   : > { %1238 = vrsqrt.f32 %v450_v23  ;;  %v431_v29 = vpop.xlane.xlu1 %430  ;;  %v429_v31 = vpop.xlane.xlu0 %428  ;;  %v669_v13 = vmul.f32 %v493_v30, %v1797_v54 }
 0x115   : > { %v1229_v35 = vpop.eup %1228  ;;  %v453_v38 = vmax.f32 %v431_v29, 1e-24  ;;  %v452_v39 = vmax.f32 %v429_v31, 1e-24  ;;  %v668_v42 = vmul.f32 %v492_v28, %v1800_v55  ;;  %v1081_v43 = vpack.c.bf16 %v493_v30, %v492_v28 }
 0x116   : > { %v1231_v46 = vpop.eup %1230  ;;  %686 = vadd.xlane.f32.xlu1 %v669_v13  ;;  %v495_v32 = vmul.f32 %v1229_v35, %v1720_v36 }
 0x117   : > { %1240 = vrsqrt.f32 %v453_v38  ;;  %684 = vadd.xlane.f32.xlu0 %v668_v42  ;;  %1082 = vst [vmem:[%s1873_s22] sm:$0xff] %v1081_v43   ;;  %v494_v33 = vmul.f32 %v1231_v46, %v1723_v37 }
 0x118   : > { %1242 = vrsqrt.f32 %v452_v39  ;;  %v435_v54 = vpop.xlane.xlu1 %434  ;;  %v433_v17 = vpop.xlane.xlu0 %432  ;;  %v671_v55 = vmul.f32 %v495_v32, %v1791_v50 }
 0x119   : > { %v1233_v58 = vpop.eup %1232  ;;  %v455_v59 = vmax.f32 %v435_v54, 1e-24  ;;  %v454_v62 = vmax.f32 %v433_v17, 1e-24  ;;  %v670_v36 = vmul.f32 %v494_v33, %v1794_v51  ;;  %v1086_v63 = vpack.c.bf16 %v495_v32, %v494_v33 }
 0x11a   : > { %v1235_v3 = vpop.eup %1234  ;;  %690 = vadd.xlane.f32.xlu1 %v671_v55  ;;  %v497_v2 = vmul.f32 %v1233_v58, %v1730_v40 }
 0x11b   : > { %1244 = vrsqrt.f32 %v455_v59  ;;  %688 = vadd.xlane.f32.xlu0 %v670_v36  ;;  %1125 = vst [vmem:[%s1873_s22 + $0x8] sm:$0xff] %v1086_v63   ;;  %v496_v37 = vmul.f32 %v1235_v3, %v1733_v41 }
 0x11c   : > { %1246 = vrsqrt.f32 %v454_v62  ;;  %v439_v21 = vpop.xlane.xlu1 %438  ;;  %v437_v4 = vpop.xlane.xlu0 %436  ;;  %v673_v50 = vmul.f32 %v497_v2, %v1812_v1 }
 0x11d   : > { %v1237_v6 = vpop.eup %1236  ;;  %v457_v7 = vmax.f32 %v439_v21, 1e-24  ;;  %v456_v10 = vmax.f32 %v437_v4, 1e-24  ;;  %v672_v51 = vmul.f32 %v496_v37, %v1816_v5  ;;  %v1091_v11 = vpack.c.bf16 %v497_v2, %v496_v37 }
 0x11e   : > { %v1239_v14 = vpop.eup %1238  ;;  %694 = vadd.xlane.f32.xlu1 %v673_v50  ;;  %v499_v40 = vmul.f32 %v1237_v6, %v1740_v44 }
 0x11f   : > { %1248 = vrsqrt.f32 %v457_v7  ;;  %692 = vadd.xlane.f32.xlu0 %v672_v51  ;;  %1126 = vst [vmem:[%s1873_s22 + $0x10] sm:$0xff] %v1091_v11   ;;  %v498_v41 = vmul.f32 %v1239_v14, %v1743_v45 }
 0x120   : > { %1250 = vrsqrt.f32 %v456_v10  ;;  %v443_v25 = vpop.xlane.xlu1 %442  ;;  %v441_v18 = vpop.xlane.xlu0 %440  ;;  %v675_v1 = vmul.f32 %v499_v40, %v1821_v19 }
 0x121   : > { %v1241_v9 = vpop.eup %1240  ;;  %v459_v22 = vmax.f32 %v443_v25, 1e-24  ;;  %v458_v23 = vmax.f32 %v441_v18, 1e-24  ;;  %v674_v5 = vmul.f32 %v498_v41, %v1825_v8  ;;  %v1096_v26 = vpack.c.bf16 %v499_v40, %v498_v41 }
 0x122   : > { %v1243_v27 = vpop.eup %1242  ;;  %698 = vadd.xlane.f32.xlu1 %v675_v1  ;;  %v501_v44 = vmul.f32 %v1241_v9, %v1750_v48 }
 0x123   : > { %1252 = vrsqrt.f32 %v459_v22  ;;  %696 = vadd.xlane.f32.xlu0 %v674_v5  ;;  %1127 = vst [vmem:[%s1873_s22 + $0x18] sm:$0xff] %v1096_v26   ;;  %v500_v45 = vmul.f32 %v1243_v27, %v1753_v49 }
 0x124   : > { %1254 = vrsqrt.f32 %v458_v23  ;;  %v677_v30 = vmul.f32 %v501_v44, %v1830_v34 }
 0x125   : > { %v1245_v19 = vpop.eup %1244  ;;  %v676_v28 = vmul.f32 %v500_v45, %v1834_v12  ;;  %v1101_v29 = vpack.c.bf16 %v501_v44, %v500_v45 }
 0x126   : > { %v1247_v8 = vpop.eup %1246  ;;  %702 = vadd.xlane.f32.xlu1 %v677_v30  ;;  %v503_v31 = vmul.f32 %v1245_v19, %v1760_v52 }
 0x127   : > { %700 = vadd.xlane.f32.xlu0 %v676_v28  ;;  %1128 = vst [vmem:[%s1873_s22 + $0x20] sm:$0xff] %v1101_v29   ;;  %v502_v48 = vmul.f32 %v1247_v8, %v1763_v53 }
 0x128   : > { %v679_v13 = vmul.f32 %v503_v31, %v1839_v47 }
 0x129   : > { %v1249_v35 = vpop.eup %1248  ;;  %v678_v49 = vmul.f32 %v502_v48, %v1843_v16  ;;  %v1106_v34 = vpack.c.bf16 %v503_v31, %v502_v48 }
 0x12a   : > { %v1251_v38 = vpop.eup %1250  ;;  %706 = vadd.xlane.f32.xlu1 %v679_v13  ;;  %v505_v12 = vmul.f32 %v1249_v35, %v1770_v56 }
 0x12b   : > { %704 = vadd.xlane.f32.xlu0 %v678_v49  ;;  %1129 = vst [vmem:[%s1873_s22 + $0x28] sm:$0xff] %v1106_v34   ;;  %v504_v39 = vmul.f32 %v1251_v38, %v1773_v57 }
 0x12c   : > { %v681_v52 = vmul.f32 %v505_v12, %v1848_v0 }
 0x12d   : > { %v1253_v53 = vpop.eup %1252  ;;  %v680_v47 = vmul.f32 %v504_v39, %v1852_v20  ;;  %v1111_v16 = vpack.c.bf16 %v505_v12, %v504_v39 }
 0x12e   : > { %v1255_v42 = vpop.eup %1254  ;;  %710 = vadd.xlane.f32.xlu1 %v681_v52  ;;  %v507_v43 = vmul.f32 %v1253_v53, %v1780_v60 }
 0x12f   : > { %708 = vadd.xlane.f32.xlu0 %v680_v47  ;;  %1130 = vst [vmem:[%s1873_s22 + $0x30] sm:$0xff] %v1111_v16   ;;  %v506_v56 = vmul.f32 %v1255_v42, %v1783_v61 }
 0x130   : > { %v683_v57 = vmul.f32 %v507_v43, %v1857_v15 }
 0x131   : > { %v682_v0 = vmul.f32 %v506_v56, %v1861_v24  ;;  %v1116_v46 = vpack.c.bf16 %v507_v43, %v506_v56 }
 0x132   : > { %714 = vadd.xlane.f32.xlu1 %v683_v57 }
 0x133   : > { %712 = vadd.xlane.f32.xlu0 %v682_v0  ;;  %1131 = vst [vmem:[%s1873_s22 + $0x38] sm:$0xff] %v1116_v46  }
 0x134   : > { %1329 = shalt.err (!%p1326_p11)
}
 0x135   : > { %s1330_s11 = scalar_lea.hbm %s1917_s5, 1024  ;;  %s1334_s26 = scalar_lea.hbm %s2042_s2, 3072 }
 0x136   : > { %p1331_p7 = scmp.ne.s32.totalorder %s1917_s5, %s1330_s11  ;;  %p1335_p1 = scmp.lt.u32.totalorder %s1917_s5, %s2042_s2 }
 0x137   : > { %p1336_p3 = scmp.lt.u32.totalorder %s1334_s26, %s1330_s11  ;;  %p1338_p12 = scmp.lt.u32.totalorder %s1330_s11, %s1917_s5 }
 0x138   : > { %p1332_p8 = pnand %p1331_p7, %p2054_p0 }
 0x139   : > { %p1337_p6 = por %p1336_p3, %p1335_p1 }
 0x13a   : > { %p1333_p13 = pneg %p1332_p8 }
 0x13b   : > { %p1339_p2 = por %p1338_p12, %p1337_p6 }
 0x13d   : > { %p1340_p9 = pnand %p1339_p2, %p1333_p13 }
 0x13f   : > { %1343 = shalt.err (!%p1340_p9)
}
 0x140   : > { %s1425_s25 = smov 64   ;;  %s1426_s12 = smov 4  }
 0x141   : > { %1136 = dma.vmem_to_hbm [thread:$0]  (%p2054_p0), %s1919_s9, 1024, %s1917_s5, %s750_s7, %s1425_s25, %s1425_s25, %s1426_s12  }
 0x142   : > { %s1953_s23 = scalar_lea.hbm %s2043_s3, %s1036_s6  ;;  %s789_s11 = sshll.u32 %s1873_s22, 4  ;;  %s1956_s11 = int_to_ptr.vmem [resolvable:$true] %s789_s11 }
 0x143   : > { %s755_s29 = scalar_lea.sflag [#allocation9], %s1612_s10  ;;  %s1344_s13 = scalar_lea.vmem %s1956_s11, 1024 }
 0x144   : > { %p1345_p4 = scmp.ne.s32.totalorder %s1956_s11, %s1344_s13  ;;  %s1427_s26 = smov [#allocation8]  }
 0x145   : > { %s1348_s9 = sshll.u32 %s1427_s26, 4  ;;  %s1349_s9 = int_to_ptr.vmem [resolvable:$false] %s1348_s9 }
 0x146   : > { %p1346_p5 = pnand %p1345_p4, %p2054_p0  ;;  %s1350_s5 = scalar_lea.vmem %s1349_s9, 2048 }
 0x147   : > { %p1351_p11 = scmp.lt.s32.totalorder %s1956_s11, %s1349_s9  ;;  %p1352_p7 = scmp.lt.s32.totalorder %s1350_s5, %s1344_s13 }
 0x148   : > { %p1347_p10 = pneg %p1346_p5 }
 0x149   : > { %p1353_p8 = por %p1352_p7, %p1351_p11 }
 0x14b   : > { %p1354_p13 = pnand %p1353_p8, %p1347_p10 }
 0x14d   : > { %1357 = shalt.err (!%p1354_p13)
}
 0x14e   : > { %s1358_s22 = scalar_lea.hbm %s1953_s23, 1024  ;;  %s1362_s20 = scalar_lea.hbm %s2043_s3, 3072 }
 0x14f   : > { %p1359_p1 = scmp.ne.s32.totalorder %s1953_s23, %s1358_s22  ;;  %p1363_p12 = scmp.lt.u32.totalorder %s1953_s23, %s2043_s3 }
 0x150   : > { %p1364_p2 = scmp.lt.u32.totalorder %s1362_s20, %s1358_s22  ;;  %p1366_p4 = scmp.lt.u32.totalorder %s1358_s22, %s1953_s23 }
 0x151   : > { %p1360_p3 = pnand %p1359_p1, %p2054_p0 }
 0x152   : > { %p1365_p9 = por %p1364_p2, %p1363_p12 }
 0x153   : > { %p1361_p6 = pneg %p1360_p3 }
 0x154   : > { %p1367_p5 = por %p1366_p4, %p1365_p9 }
 0x156   : > { %p1368_p10 = pnand %p1367_p5, %p1361_p6 }
 0x158   : > { %1371 = shalt.err (!%p1368_p10)
}
 0x159   : > { %1137 = dma.vmem_to_hbm [thread:$0]  (%p2054_p0), %s1956_s11, 1024, %s1953_s23, %s755_s29, %s1425_s25, %s1425_s25, %s1426_s12   ;;  %vm732_vm0 = vcmask 7168  }
 0x15a   : > { %s960_s30 = sshll.u32 %s1474_s19, 4 }
 0x15b   : > { %p279_p11 = scmp.lt.s32.totalorder %s960_s30, 47 }
 0x15d   : > { %s2061_s30 = smov (!%p279_p11, %s960_s30), 47 }
 0x15e   : > { %s961_s13 = sshll.u32 %s2061_s30, 3 }
 0x15f   : > { %s1989_s5 = scalar_lea.vmem %s2044_s4, %s961_s13 }
 0x1a3   : > { %v687_v60 = vpop.xlane.xlu1 %686 }
 0x1a4   : > { %v717_v61 = vmul.f32 5.0, %v687_v60  ;;  %v685_v20 = vpop.xlane.xlu0 %684 }
 0x1a5   : > { %v716_v15 = vmul.f32 5.0, %v685_v20 }
 0x1a6   : > { %734 = vst.msk [vmem:[%s1989_s5 + $0x8] sm:$0xff] %vm732_vm0, %v717_v61 }
 0x1a7   : > { %733 = vst.msk [vmem:[%s1989_s5] sm:$0xff] %vm732_vm0, %v716_v15  ;;  %v691_v24 = vpop.xlane.xlu1 %690 }
 0x1a8   : > { %v719_v32 = vmul.f32 5.0, %v691_v24  ;;  %v689_v33 = vpop.xlane.xlu0 %688 }
 0x1a9   : > { %v718_v54 = vmul.f32 5.0, %v689_v33 }
 0x1aa   : > { %736 = vst.msk [vmem:[%s1989_s5 + $0x18] sm:$0xff] %vm732_vm0, %v719_v32 }
 0x1ab   : > { %735 = vst.msk [vmem:[%s1989_s5 + $0x10] sm:$0xff] %vm732_vm0, %v718_v54  ;;  %v695_v17 = vpop.xlane.xlu1 %694 }
 0x1ac   : > { %v721_v55 = vmul.f32 5.0, %v695_v17  ;;  %v693_v58 = vpop.xlane.xlu0 %692 }
 0x1ad   : > { %v720_v59 = vmul.f32 5.0, %v693_v58 }
 0x1ae   : > { %738 = vst.msk [vmem:[%s1989_s5 + $0x28] sm:$0xff] %vm732_vm0, %v721_v55 }
 0x1af   : > { %737 = vst.msk [vmem:[%s1989_s5 + $0x20] sm:$0xff] %vm732_vm0, %v720_v59  ;;  %v699_v62 = vpop.xlane.xlu1 %698 }
 0x1b0   : > { %v723_v36 = vmul.f32 5.0, %v699_v62  ;;  %v697_v63 = vpop.xlane.xlu0 %696 }
 0x1b1   : > { %v722_v3 = vmul.f32 5.0, %v697_v63 }
 0x1b2   : > { %740 = vst.msk [vmem:[%s1989_s5 + $0x38] sm:$0xff] %vm732_vm0, %v723_v36 }
 0x1b3   : > { %739 = vst.msk [vmem:[%s1989_s5 + $0x30] sm:$0xff] %vm732_vm0, %v722_v3  ;;  %v703_v2 = vpop.xlane.xlu1 %702 }
 0x1b4   : > { %v725_v37 = vmul.f32 5.0, %v703_v2  ;;  %v701_v21 = vpop.xlane.xlu0 %700 }
 0x1b5   : > { %v724_v4 = vmul.f32 5.0, %v701_v21 }
 0x1b6   : > { %742 = vst.msk [vmem:[%s1989_s5 + $0x48] sm:$0xff] %vm732_vm0, %v725_v37 }
 0x1b7   : > { %741 = vst.msk [vmem:[%s1989_s5 + $0x40] sm:$0xff] %vm732_vm0, %v724_v4  ;;  %v707_v50 = vpop.xlane.xlu1 %706 }
 0x1b8   : > { %v727_v6 = vmul.f32 5.0, %v707_v50  ;;  %v705_v7 = vpop.xlane.xlu0 %704 }
 0x1b9   : > { %v726_v10 = vmul.f32 5.0, %v705_v7 }
 0x1ba   : > { %744 = vst.msk [vmem:[%s1989_s5 + $0x58] sm:$0xff] %vm732_vm0, %v727_v6 }
 0x1bb   : > { %743 = vst.msk [vmem:[%s1989_s5 + $0x50] sm:$0xff] %vm732_vm0, %v726_v10  ;;  %v711_v51 = vpop.xlane.xlu1 %710 }
 0x1bc   : > { %v729_v11 = vmul.f32 5.0, %v711_v51  ;;  %v709_v14 = vpop.xlane.xlu0 %708 }
 0x1bd   : > { %v728_v40 = vmul.f32 5.0, %v709_v14 }
 0x1be   : > { %746 = vst.msk [vmem:[%s1989_s5 + $0x68] sm:$0xff] %vm732_vm0, %v729_v11 }
 0x1bf   : > { %745 = vst.msk [vmem:[%s1989_s5 + $0x60] sm:$0xff] %vm732_vm0, %v728_v40  ;;  %v715_v41 = vpop.xlane.xlu1 %714 }
 0x1c0   : > { %v731_v25 = vmul.f32 5.0, %v715_v41  ;;  %v713_v18 = vpop.xlane.xlu0 %712 }
 0x1c1   : > { %v730_v1 = vmul.f32 5.0, %v713_v18 }
 0x1c2   : > { %748 = vst.msk [vmem:[%s1989_s5 + $0x78] sm:$0xff] %vm732_vm0, %v731_v25 }
 0x1c3   : > { %747 = vst.msk [vmem:[%s1989_s5 + $0x70] sm:$0xff] %vm732_vm0, %v730_v1 }
 0x1c4 PF: > { %p1155_p0 = scmp.ge.s32.totalorder %s1418_s18, 2  ;;  %s808_s19 = sand.u32 1, %s1406_s15  }
 0x1c5   : > { %p2055_p7 = scmp.ne.s32.totalorder %s2050_s28, 0  ;;  %s809_s27 = scalar_lea.sflag [#allocation4], %s808_s19 }
 0x1c7   : > { %p1148_p8 = pnand %p1155_p0, %p2055_p7 }
 0x1c9   : > { %1397 = dma.done.wait (!%p1148_p8), %s809_s27, 1024  }
 0x1ca   : > { %1399 = vsyncadd (!%p1148_p8), %s809_s27, 4294966272  ;;  %s818_s10 = scalar_lea.sflag [#allocation9], %s808_s19 }
 0x1cb   : > { %1401 = dma.done.wait (!%p1148_p8), %s818_s10, 1024  }
 0x1cc   : > { %1403 = vsyncadd (!%p1148_p8), %s818_s10, 4294966272  ;;  %p24_p13 = scmp.ge.s32.totalorder %s1478_s21, 5   ;;  %s2056_s15 = smov %s1410_s16 }
 0x1cd   : > { %s2057_s16 = smov %s1414_s17  ;;  %s2058_s17 = smov %s1490_s24 }
 0x1ce   : > { %s2059_s18 = smov %s1478_s21  ;;  %26 = sbr.rel (!%p24_p13) target bundleno = 9 (0x9), region = 115 }
 0x1d5   :  { %831 = vsyncpa [#allocation3], 1 }
 0x1d6   :  { %833 = vsyncpa [#allocation3 + $0x1], 1 }
 0x1d7   :  { %834 = vsyncpa [#allocation6], 1 }
 0x1d8   :  { %836 = vsyncpa [#allocation6 + $0x1], 1 }
 0x1d9   :  { %837 = vsyncpa [#allocation4], 1 }
 0x1da   :  { %839 = vsyncpa [#allocation4 + $0x1], 1 }
 0x1db   :  { %840 = vsyncpa [#allocation9], 1 }
 0x1dc   :  { %842 = vsyncpa [#allocation9 + $0x1], 1 }

</bundles_post_ra>
